<compile_context>
chip_gen: v7x
topology: tpu7x:2x2x1
jax: 0.10.0
libtpu: 0.0.40
codegen_flags: <defaults>
</compile_context>

<pallas_src>
import functools

import jax
import jax.numpy as jnp
from jax.experimental import pallas as pl
from jax.experimental.pallas import tpu as pltpu

TEMP = 2.0  # distillation temperature


def _max2(x):
    """Full max over a rank-2 array, keepdims -> (1, 1)."""
    return jnp.max(jnp.max(x, axis=1, keepdims=True), axis=0, keepdims=True)


def _sum2(x):
    """Full sum over a rank-2 array, keepdims -> (1, 1)."""
    return jnp.sum(jnp.sum(x, axis=1, keepdims=True), axis=0, keepdims=True)


# ---------------------------------------------------------------------------
# Fused training kernel, grid = (B,), one image per step.
#   ws/bs/wt/bt : SMEM scalars (1x1 conv weights/biases, C channels -> 1)
#   x_lr_ref : (1, C*Hl, Wl) f32 VMEM block   (channel planes stacked on sublanes)
#   x_hr_ref : (1, C*Hh, Wh) f32 VMEM block
#   labels   : (1, Hl, Wl)   f32 VMEM block
#   mwt_ref  : (Wl, Wh) bf16 VMEM (resident)  1-D W-interp matrix, transposed
#   mh_ref   : (Hh, Hl) bf16 VMEM (resident)  1-D H-interp matrix
#   o_ref    : (2,) f32 SMEM output = [loss_sod, loss_dist]
#   acc_ref  : (3,) f32 SMEM scratch = [bce_sum, wiou_sum, kl_sum]
# ---------------------------------------------------------------------------
def _fused_loss_kernel(n_batch,
                       ws_ref, bs_ref, wt_ref, bt_ref,
                       x_lr_ref, x_hr_ref, labels_ref, mwt_ref, mh_ref,
                       o_ref, acc_ref):
    b = pl.program_id(0)
    C = ws_ref.shape[0]
    Hl, Wl = labels_ref.shape[1], labels_ref.shape[2]
    Hh = mh_ref.shape[0]

    @pl.when(b == 0)
    def _init():
        acc_ref[0] = jnp.float32(0.0)
        acc_ref[1] = jnp.float32(0.0)
        acc_ref[2] = jnp.float32(0.0)

    # --- 1x1-conv saliency heads: per-channel VPU FMA on (H, W) planes ---
    s = x_lr_ref[0, pl.ds(0, Hl), :] * ws_ref[0]
    for c in range(1, C):                       # C is tiny & static -> unrolled
        s = s + x_lr_ref[0, pl.ds(c * Hl, Hl), :] * ws_ref[c]
    s = s + bs_ref[0]                           # (Hl, Wl) student logits

    t = x_hr_ref[0, pl.ds(0, Hh), :] * wt_ref[0]
    for c in range(1, C):
        t = t + x_hr_ref[0, pl.ds(c * Hh, Hh), :] * wt_ref[c]
    t = t + bt_ref[0]                           # (Hh, Wh) teacher logits

    # --- structure loss partial sums for this image ---
    z = labels_ref[0]                           # (Hl, Wl)
    e = jnp.exp(-jnp.abs(s))                    # single EUP exp pass
    bce = jnp.maximum(s, 0.0) - s * z + jnp.log1p(e)
    inv1pe = pl.reciprocal(1.0 + e, approx=True)        # EUP, frees the VPU
    p = jnp.where(s >= 0.0, inv1pe, e * inv1pe)         # sigmoid(s)
    inter = jnp.sum(p * z)
    union = jnp.sum(p + z)
    wiou = 1.0 - (inter + 1.0) / (union - inter + 1.0)

    # --- distillation: separable bilinear align_corners upsample on the MXU ---
    tmp = jnp.dot(s.astype(jnp.bfloat16), mwt_ref[...],
                  preferred_element_type=jnp.float32)    # (Hl, Wh)
    up = jnp.dot(mh_ref[...], tmp.astype(jnp.bfloat16),
                 preferred_element_type=jnp.float32)     # (Hh, Wh)

    inv_temp = 1.0 / TEMP
    sl = up * inv_temp
    tl = t * inv_temp
    # full-image (per-batch row) softmax / log-softmax statistics
    s_shift = sl - _max2(sl)
    s_logz = jnp.log(_sum2(jnp.exp(s_shift)))            # (1, 1)
    t_shift = tl - _max2(tl)
    t_exp = jnp.exp(t_shift)
    t_sum = _sum2(t_exp)                                 # (1, 1)
    t_p = t_exp * pl.reciprocal(t_sum, approx=True)
    t_logp = t_shift - jnp.log(t_sum)
    s_logp = s_shift - s_logz
    kl = jnp.sum(t_p * (t_logp - s_logp))                # this image's KL sum

    acc_ref[0] = acc_ref[0] + jnp.sum(bce)
    acc_ref[1] = acc_ref[1] + wiou
    acc_ref[2] = acc_ref[2] + kl

    @pl.when(b == pl.num_programs(0) - 1)
    def _finalize():
        wbce = acc_ref[0] * (1.0 / (n_batch * Hl * Wl))
        o_ref[0] = wbce + acc_ref[1] * (1.0 / n_batch)   # loss_sod
        o_ref[1] = 0.1 * acc_ref[2] * (1.0 / n_batch)    # loss_distillation


# ---------------------------------------------------------------------------
# Eval kernel, grid = (B,), lane-dense (1, 1, H*W) output block per image.
# ---------------------------------------------------------------------------
def _smap_kernel(w_ref, b_ref, x_ref, o_ref):
    C = w_ref.shape[0]
    HW = o_ref.shape[2]
    y = x_ref[:, :, pl.ds(0, HW)] * w_ref[0]
    for c in range(1, C):
        y = y + x_ref[:, :, pl.ds(c * HW, HW)] * w_ref[c]
    o_ref[...] = y + b_ref[0]


# ---------------------------------------------------------------------------
# Glue
# ---------------------------------------------------------------------------
def _interp_matrix(n_out, n_in):
    """1-D bilinear (align_corners=True) interpolation matrix, shape (n_out, n_in)."""
    if n_out == 1:
        src = jnp.zeros((1,), jnp.float32)
    else:
        src = jnp.arange(n_out, dtype=jnp.float32) * ((n_in - 1) / (n_out - 1))
    i0 = jnp.clip(jnp.floor(src).astype(jnp.int32), 0, n_in - 1)
    i1 = jnp.clip(i0 + 1, 0, n_in - 1)
    frac = src - i0.astype(jnp.float32)
    m = jnp.zeros((n_out, n_in), jnp.float32)
    rows = jnp.arange(n_out)
    m = m.at[rows, i0].add(1.0 - frac)
    m = m.at[rows, i1].add(frac)
    return m


def transxnet_logits_forward(params, x_lr, x_hr=None, labels_lr=None, training=True):
    B, C, Hl, Wl = x_lr.shape
    smem = pl.BlockSpec(memory_space=pltpu.MemorySpace.SMEM)

    if not training:
        x_flat = x_lr.reshape(B, 1, C * Hl * Wl)          # free view, no transpose
        smap = pl.pallas_call(
            _smap_kernel,
            out_shape=jax.ShapeDtypeStruct((B, 1, Hl * Wl), jnp.float32),
            grid_spec=pltpu.PrefetchScalarGridSpec(
                num_scalar_prefetch=0,
                grid=(B,),
                in_specs=[
                    smem,                                              # ws
                    smem,                                              # bs
                    pl.BlockSpec((1, 1, C * Hl * Wl), lambda b: (b, 0, 0)),
                ],
                out_specs=pl.BlockSpec((1, 1, Hl * Wl), lambda b: (b, 0, 0)),
            ),
            compiler_params=pltpu.CompilerParams(
                dimension_semantics=("parallel",)),
        )(params["ws"], params["bs"], x_flat)
        return smap.reshape(B, 1, Hl, Wl)

    _, _, Hh, Wh = x_hr.shape
    # Free reshapes only — no relayout / transpose HBM pass.
    x_lr_v = x_lr.reshape(B, C * Hl, Wl)
    x_hr_v = x_hr.reshape(B, C * Hh, Wh)
    labels_v = labels_lr.reshape(B, Hl, Wl)
    # Small separable interpolation matrices (bf16 for the MXU; f32 accumulate).
    mh = _interp_matrix(Hh, Hl).astype(jnp.bfloat16)      # (Hh, Hl)
    mwT = _interp_matrix(Wh, Wl).T.astype(jnp.bfloat16)   # (Wl, Wh)

    losses = pl.pallas_call(
        functools.partial(_fused_loss_kernel, B),
        out_shape=jax.ShapeDtypeStruct((2,), jnp.float32),
        grid_spec=pltpu.PrefetchScalarGridSpec(
            num_scalar_prefetch=0,
            grid=(B,),
            in_specs=[
                smem,                                                  # ws
                smem,                                                  # bs
                smem,                                                  # wt
                smem,                                                  # bt
                pl.BlockSpec((1, C * Hl, Wl), lambda b: (b, 0, 0)),    # x_lr
                pl.BlockSpec((1, C * Hh, Wh), lambda b: (b, 0, 0)),    # x_hr
                pl.BlockSpec((1, Hl, Wl), lambda b: (b, 0, 0)),        # labels
                pl.BlockSpec((Wl, Wh), lambda b: (0, 0)),              # mwT (resident)
                pl.BlockSpec((Hh, Hl), lambda b: (0, 0)),              # mh  (resident)
            ],
            out_specs=pl.BlockSpec(memory_space=pltpu.MemorySpace.SMEM),
            scratch_shapes=[pltpu.SMEM((3,), jnp.float32)],
        ),
        compiler_params=pltpu.CompilerParams(
            dimension_semantics=("arbitrary",)),       # shared scalar accumulators
    )(params["ws"], params["bs"], params["wt"], params["bt"],
      x_lr_v, x_hr_v, labels_v, mwT, mh)

    return losses[0], losses[1]


# ---------------------------------------------------------------------------
# Pure-JAX reference (for verification)
# ---------------------------------------------------------------------------
def _ref_forward(params, x_lr, x_hr, labels_lr):
    def conv(x, w, b):
        return jnp.einsum("bchw,c->bhw", x, w, precision="highest")[:, None] + b[0]

    s = conv(x_lr, params["ws"], params["bs"])      # (B,1,Hl,Wl)
    t = conv(x_hr, params["wt"], params["bt"])      # (B,1,Hh,Wh)

    # structure_loss
    x, z = s, labels_lr
    bce = jnp.maximum(x, 0.0) - x * z + jnp.log1p(jnp.exp(-jnp.abs(x)))
    wbce = jnp.mean(bce)
    p = jax.nn.sigmoid(x)
    inter = jnp.sum(p * z, axis=(2, 3))
    union = jnp.sum(p + z, axis=(2, 3))
    wiou = 1.0 - (inter + 1.0) / (union - inter + 1.0)
    loss_sod = wbce + jnp.mean(wiou)

    # distillation_loss (separable bilinear align_corners upsample)
    B = s.shape[0]
    Hh, Wh = t.shape[2:]
    mh = _interp_matrix(Hh, s.shape[2])
    mw = _interp_matrix(Wh, s.shape[3])
    up = jnp.einsum("hp,bpq,wq->bhw", mh, s[:, 0], mw, precision="highest")
    sl = up.reshape(B, -1) / TEMP
    tl = t[:, 0].reshape(B, -1) / TEMP
    s_logp = jax.nn.log_softmax(sl, axis=1)
    t_p = jax.nn.softmax(tl, axis=1)
    kl = jnp.sum(t_p * (jnp.log(t_p) - s_logp)) / B
    return loss_sod, kl * 0.1, s


if __name__ == "__main__":
    key = jax.random.PRNGKey(0)
    k1, k2, k3, k4, k5, k6, k7 = jax.random.split(key, 7)

    B, C, img_size = 2, 3, 16
    x_lr = jax.random.normal(k1, (B, C, img_size, img_size), jnp.float32)
    x_hr = jax.random.normal(k2, (B, C, 2 * img_size, 2 * img_size), jnp.float32)
    labels_lr = jnp.round(
        jax.random.uniform(k3, (B, 1, img_size, img_size), jnp.float32))

    params = {
        "ws": 0.5 * jax.random.normal(k4, (C,), jnp.float32),
        "bs": 0.1 * jax.random.normal(k5, (1,), jnp.float32),
        "wt": 0.5 * jax.random.normal(k6, (C,), jnp.float32),
        "bt": 0.1 * jax.random.normal(k7, (1,), jnp.float32),
    }

    # training path (fused batch-gridded kernel -> two losses)
    loss_sod, loss_dist = transxnet_logits_forward(params, x_lr, x_hr, labels_lr,
                                                   training=True)
    # eval path (lane-dense saliency map, batch-parallel grid)
    smap = transxnet_logits_forward(params, x_lr, training=False)
    jax.block_until_ready((loss_sod, loss_dist, smap))

    ref_sod, ref_dist, ref_smap = _ref_forward(params, x_lr, x_hr, labels_lr)
    assert jnp.allclose(loss_sod, ref_sod, rtol=5e-2, atol=1e-3), (loss_sod, ref_sod)
    assert jnp.allclose(loss_dist, ref_dist, rtol=5e-2, atol=1e-3), (loss_dist, ref_dist)
    assert jnp.allclose(smap, ref_smap, rtol=1e-4, atol=1e-4), "saliency map mismatch"

    print("KERNEL_OK")
</pallas_src>

<mosaic_0001>
module attributes {stable_mosaic.version = 11 : i64} {
  func.func @_fused_loss_kernel(%arg0: i32, %arg1: memref<3xf32, #tpu.memory_space<smem>>, %arg2: memref<1xf32, #tpu.memory_space<smem>>, %arg3: memref<3xf32, #tpu.memory_space<smem>>, %arg4: memref<1xf32, #tpu.memory_space<smem>>, %arg5: memref<1x48x16xf32, #tpu.memory_space<vmem>>, %arg6: memref<1x96x32xf32, #tpu.memory_space<vmem>>, %arg7: memref<1x16x16xf32, #tpu.memory_space<vmem>>, %arg8: memref<16x32xbf16, #tpu.memory_space<vmem>>, %arg9: memref<32x16xbf16, #tpu.memory_space<vmem>>, %arg10: memref<2xf32, #tpu.memory_space<smem>>, %arg11: memref<3xf32, #tpu.memory_space<smem>>) attributes {dimension_semantics = [#tpu.dimension_semantics<arbitrary>], iteration_bounds = array<i64: 2>, scalar_prefetch = 0 : i64, scratch_operands = 1 : i64, tpu.core_type = #tpu.core_type<tc>, window_params = [{transform_indices = @transform_0, window_bounds = array<i64: 3>}, {transform_indices = @transform_1, window_bounds = array<i64: 1>}, {transform_indices = @transform_2, window_bounds = array<i64: 3>}, {transform_indices = @transform_3, window_bounds = array<i64: 1>}, {transform_indices = @transform_4, window_bounds = array<i64: 1, 48, 16>}, {transform_indices = @transform_5, window_bounds = array<i64: 1, 96, 32>}, {transform_indices = @transform_6, window_bounds = array<i64: 1, 16, 16>}, {pipeline_mode = #tpu.pipeline_mode<synchronous>, transform_indices = @transform_7, window_bounds = array<i64: 16, 32>}, {pipeline_mode = #tpu.pipeline_mode<synchronous>, transform_indices = @transform_8, window_bounds = array<i64: 32, 16>}, {transform_indices = @transform_9, window_bounds = array<i64: 2>}]} {
    %c0_i32 = arith.constant 0 : i32
    %0 = arith.cmpi eq, %arg0, %c0_i32 : i32
    %1 = arith.extui %0 : i1 to i32
    %c0_i32_0 = arith.constant 0 : i32
    %2 = arith.cmpi ne, %1, %c0_i32_0 : i32
    scf.if %2 {
      %cst_57 = arith.constant 0.000000e+00 : f32
      %c0_58 = arith.constant 0 : index
      %140 = memref.load %arg11[%c0_58] : memref<3xf32, #tpu.memory_space<smem>>
      memref.store %cst_57, %arg11[%c0_58] : memref<3xf32, #tpu.memory_space<smem>>
      %cst_59 = arith.constant 0.000000e+00 : f32
      %c1_60 = arith.constant 1 : index
      %141 = memref.load %arg11[%c1_60] : memref<3xf32, #tpu.memory_space<smem>>
      memref.store %cst_59, %arg11[%c1_60] : memref<3xf32, #tpu.memory_space<smem>>
      %cst_61 = arith.constant 0.000000e+00 : f32
      %c2_62 = arith.constant 2 : index
      %142 = memref.load %arg11[%c2_62] : memref<3xf32, #tpu.memory_space<smem>>
      memref.store %cst_61, %arg11[%c2_62] : memref<3xf32, #tpu.memory_space<smem>>
    } else {
    }
    %c0 = arith.constant 0 : index
    %c0_1 = arith.constant 0 : index
    %c0_2 = arith.constant 0 : index
    %3 = vector.load %arg5[%c0, %c0_1, %c0_2] : memref<1x48x16xf32, #tpu.memory_space<vmem>>, vector<1x16x16xf32>
    %4 = vector.shape_cast %3 : vector<1x16x16xf32> to vector<16x16xf32>
    %c0_3 = arith.constant 0 : index
    %5 = memref.load %arg1[%c0_3] : memref<3xf32, #tpu.memory_space<smem>>
    %6 = vector.broadcast %5 : f32 to vector<16x16xf32>
    %7 = arith.mulf %4, %6 : vector<16x16xf32>
    %c0_4 = arith.constant 0 : index
    %c16 = arith.constant 16 : index
    %c0_5 = arith.constant 0 : index
    %8 = vector.load %arg5[%c0_4, %c16, %c0_5] : memref<1x48x16xf32, #tpu.memory_space<vmem>>, vector<1x16x16xf32>
    %9 = vector.shape_cast %8 : vector<1x16x16xf32> to vector<16x16xf32>
    %c1 = arith.constant 1 : index
    %10 = memref.load %arg1[%c1] : memref<3xf32, #tpu.memory_space<smem>>
    %11 = vector.broadcast %10 : f32 to vector<16x16xf32>
    %12 = arith.mulf %9, %11 : vector<16x16xf32>
    %13 = arith.addf %7, %12 : vector<16x16xf32>
    %c0_6 = arith.constant 0 : index
    %c32 = arith.constant 32 : index
    %c0_7 = arith.constant 0 : index
    %14 = vector.load %arg5[%c0_6, %c32, %c0_7] : memref<1x48x16xf32, #tpu.memory_space<vmem>>, vector<1x16x16xf32>
    %15 = vector.shape_cast %14 : vector<1x16x16xf32> to vector<16x16xf32>
    %c2 = arith.constant 2 : index
    %16 = memref.load %arg1[%c2] : memref<3xf32, #tpu.memory_space<smem>>
    %17 = vector.broadcast %16 : f32 to vector<16x16xf32>
    %18 = arith.mulf %15, %17 : vector<16x16xf32>
    %19 = arith.addf %13, %18 : vector<16x16xf32>
    %c0_8 = arith.constant 0 : index
    %20 = memref.load %arg2[%c0_8] : memref<1xf32, #tpu.memory_space<smem>>
    %21 = vector.broadcast %20 : f32 to vector<16x16xf32>
    %22 = arith.addf %19, %21 : vector<16x16xf32>
    %c0_9 = arith.constant 0 : index
    %c0_10 = arith.constant 0 : index
    %c0_11 = arith.constant 0 : index
    %23 = vector.load %arg6[%c0_9, %c0_10, %c0_11] : memref<1x96x32xf32, #tpu.memory_space<vmem>>, vector<1x32x32xf32>
    %24 = vector.shape_cast %23 : vector<1x32x32xf32> to vector<32x32xf32>
    %c0_12 = arith.constant 0 : index
    %25 = memref.load %arg3[%c0_12] : memref<3xf32, #tpu.memory_space<smem>>
    %26 = vector.broadcast %25 : f32 to vector<32x32xf32>
    %27 = arith.mulf %24, %26 : vector<32x32xf32>
    %c0_13 = arith.constant 0 : index
    %c32_14 = arith.constant 32 : index
    %c0_15 = arith.constant 0 : index
    %28 = vector.load %arg6[%c0_13, %c32_14, %c0_15] : memref<1x96x32xf32, #tpu.memory_space<vmem>>, vector<1x32x32xf32>
    %29 = vector.shape_cast %28 : vector<1x32x32xf32> to vector<32x32xf32>
    %c1_16 = arith.constant 1 : index
    %30 = memref.load %arg3[%c1_16] : memref<3xf32, #tpu.memory_space<smem>>
    %31 = vector.broadcast %30 : f32 to vector<32x32xf32>
    %32 = arith.mulf %29, %31 : vector<32x32xf32>
    %33 = arith.addf %27, %32 : vector<32x32xf32>
    %c0_17 = arith.constant 0 : index
    %c64 = arith.constant 64 : index
    %c0_18 = arith.constant 0 : index
    %34 = vector.load %arg6[%c0_17, %c64, %c0_18] : memref<1x96x32xf32, #tpu.memory_space<vmem>>, vector<1x32x32xf32>
    %35 = vector.shape_cast %34 : vector<1x32x32xf32> to vector<32x32xf32>
    %c2_19 = arith.constant 2 : index
    %36 = memref.load %arg3[%c2_19] : memref<3xf32, #tpu.memory_space<smem>>
    %37 = vector.broadcast %36 : f32 to vector<32x32xf32>
    %38 = arith.mulf %35, %37 : vector<32x32xf32>
    %39 = arith.addf %33, %38 : vector<32x32xf32>
    %c0_20 = arith.constant 0 : index
    %40 = memref.load %arg4[%c0_20] : memref<1xf32, #tpu.memory_space<smem>>
    %41 = vector.broadcast %40 : f32 to vector<32x32xf32>
    %42 = arith.addf %39, %41 : vector<32x32xf32>
    %c0_21 = arith.constant 0 : index
    %c0_22 = arith.constant 0 : index
    %c0_23 = arith.constant 0 : index
    %43 = vector.load %arg7[%c0_21, %c0_22, %c0_23] : memref<1x16x16xf32, #tpu.memory_space<vmem>>, vector<1x16x16xf32>
    %44 = vector.shape_cast %43 : vector<1x16x16xf32> to vector<16x16xf32>
    %45 = math.absf %22 : vector<16x16xf32>
    %cst = arith.constant 0.000000e+00 : f32
    %46 = vector.broadcast %cst : f32 to vector<16x16xf32>
    %47 = arith.subf %46, %45 : vector<16x16xf32>
    %48 = math.exp %47 : vector<16x16xf32>
    %cst_24 = arith.constant 0.000000e+00 : f32
    %49 = vector.broadcast %cst_24 : f32 to vector<16x16xf32>
    %50 = arith.maximumf %22, %49 : vector<16x16xf32>
    %51 = arith.mulf %22, %44 : vector<16x16xf32>
    %52 = arith.subf %50, %51 : vector<16x16xf32>
    %53 = math.log1p %48 : vector<16x16xf32>
    %54 = arith.addf %52, %53 : vector<16x16xf32>
    %cst_25 = arith.constant 1.000000e+00 : f32
    %55 = vector.broadcast %cst_25 : f32 to vector<16x16xf32>
    %56 = arith.addf %55, %48 : vector<16x16xf32>
    %57 = tpu.reciprocal %56 {approx = true} : vector<16x16xf32> -> vector<16x16xf32>
    %cst_26 = arith.constant 0.000000e+00 : f32
    %58 = vector.broadcast %cst_26 : f32 to vector<16x16xf32>
    %59 = arith.cmpf oge, %22, %58 : vector<16x16xf32>
    %60 = arith.mulf %48, %57 : vector<16x16xf32>
    %61 = arith.select %59, %57, %60 : vector<16x16xi1>, vector<16x16xf32>
    %62 = arith.mulf %61, %44 : vector<16x16xf32>
    %63 = vector.shape_cast %62 : vector<16x16xf32> to vector<1x16x16xf32>
    %cst_27 = arith.constant dense<0.000000e+00> : vector<1xf32>
    %64 = vector.multi_reduction <add>, %63, %cst_27 [1, 2] : vector<1x16x16xf32> to vector<1xf32>
    %65 = vector.shape_cast %64 : vector<1xf32> to vector<1x1x1xf32>
    %66 = vector.extract %65[0, 0, 0] : f32 from vector<1x1x1xf32>
    %67 = arith.addf %61, %44 : vector<16x16xf32>
    %68 = vector.shape_cast %67 : vector<16x16xf32> to vector<1x16x16xf32>
    %cst_28 = arith.constant dense<0.000000e+00> : vector<1xf32>
    %69 = vector.multi_reduction <add>, %68, %cst_28 [1, 2] : vector<1x16x16xf32> to vector<1xf32>
    %70 = vector.shape_cast %69 : vector<1xf32> to vector<1x1x1xf32>
    %71 = vector.extract %70[0, 0, 0] : f32 from vector<1x1x1xf32>
    %cst_29 = arith.constant 1.000000e+00 : f32
    %72 = arith.addf %66, %cst_29 : f32
    %73 = arith.subf %71, %66 : f32
    %cst_30 = arith.constant 1.000000e+00 : f32
    %74 = arith.addf %73, %cst_30 : f32
    %75 = arith.divf %72, %74 : f32
    %cst_31 = arith.constant 1.000000e+00 : f32
    %76 = arith.subf %cst_31, %75 : f32
    %77 = arith.truncf %22 : vector<16x16xf32> to vector<16x16xbf16>
    %c0_32 = arith.constant 0 : index
    %c0_33 = arith.constant 0 : index
    %78 = vector.load %arg8[%c0_32, %c0_33] : memref<16x32xbf16, #tpu.memory_space<vmem>>, vector<16x32xbf16>
    %cst_34 = arith.constant dense<0.000000e+00> : vector<16x32xf32>
    %79 = tpu.matmul %77, %78, %cst_34 {dimension_numbers = #tpu.dot_dimension_numbers<[1], [0], [0], [1], [0, 0, 1, 1], [], []>} : vector<16x16xbf16>, vector<16x32xbf16>, vector<16x32xf32> -> vector<16x32xf32>
    %c0_35 = arith.constant 0 : index
    %c0_36 = arith.constant 0 : index
    %80 = vector.load %arg9[%c0_35, %c0_36] : memref<32x16xbf16, #tpu.memory_space<vmem>>, vector<32x16xbf16>
    %81 = arith.truncf %79 : vector<16x32xf32> to vector<16x32xbf16>
    %cst_37 = arith.constant dense<0.000000e+00> : vector<32x32xf32>
    %82 = tpu.matmul %80, %81, %cst_37 {dimension_numbers = #tpu.dot_dimension_numbers<[1], [0], [0], [1], [0, 0, 1, 1], [], []>} : vector<32x16xbf16>, vector<16x32xbf16>, vector<32x32xf32> -> vector<32x32xf32>
    %cst_38 = arith.constant 5.000000e-01 : f32
    %83 = vector.broadcast %cst_38 : f32 to vector<32x32xf32>
    %84 = arith.mulf %82, %83 : vector<32x32xf32>
    %cst_39 = arith.constant 5.000000e-01 : f32
    %85 = vector.broadcast %cst_39 : f32 to vector<32x32xf32>
    %86 = arith.mulf %42, %85 : vector<32x32xf32>
    %cst_40 = arith.constant dense<0xFF800000> : vector<32xf32>
    %87 = vector.multi_reduction <maximumf>, %84, %cst_40 [1] : vector<32x32xf32> to vector<32xf32>
    %88 = vector.shape_cast %87 : vector<32xf32> to vector<32x1xf32>
    %cst_41 = arith.constant dense<0xFF800000> : vector<1xf32>
    %89 = vector.multi_reduction <maximumf>, %88, %cst_41 [0] : vector<32x1xf32> to vector<1xf32>
    %90 = vector.shape_cast %89 : vector<1xf32> to vector<1x1xf32>
    %91 = vector.broadcast %90 : vector<1x1xf32> to vector<32x32xf32>
    %92 = arith.subf %84, %91 : vector<32x32xf32>
    %93 = math.exp %92 : vector<32x32xf32>
    %cst_42 = arith.constant dense<0.000000e+00> : vector<32xf32>
    %94 = vector.multi_reduction <add>, %93, %cst_42 [1] : vector<32x32xf32> to vector<32xf32>
    %95 = vector.shape_cast %94 : vector<32xf32> to vector<32x1xf32>
    %cst_43 = arith.constant dense<0.000000e+00> : vector<1xf32>
    %96 = vector.multi_reduction <add>, %95, %cst_43 [0] : vector<32x1xf32> to vector<1xf32>
    %97 = vector.shape_cast %96 : vector<1xf32> to vector<1x1xf32>
    %98 = math.log %97 : vector<1x1xf32>
    %cst_44 = arith.constant dense<0xFF800000> : vector<32xf32>
    %99 = vector.multi_reduction <maximumf>, %86, %cst_44 [1] : vector<32x32xf32> to vector<32xf32>
    %100 = vector.shape_cast %99 : vector<32xf32> to vector<32x1xf32>
    %cst_45 = arith.constant dense<0xFF800000> : vector<1xf32>
    %101 = vector.multi_reduction <maximumf>, %100, %cst_45 [0] : vector<32x1xf32> to vector<1xf32>
    %102 = vector.shape_cast %101 : vector<1xf32> to vector<1x1xf32>
    %103 = vector.broadcast %102 : vector<1x1xf32> to vector<32x32xf32>
    %104 = arith.subf %86, %103 : vector<32x32xf32>
    %105 = math.exp %104 : vector<32x32xf32>
    %cst_46 = arith.constant dense<0.000000e+00> : vector<32xf32>
    %106 = vector.multi_reduction <add>, %105, %cst_46 [1] : vector<32x32xf32> to vector<32xf32>
    %107 = vector.shape_cast %106 : vector<32xf32> to vector<32x1xf32>
    %cst_47 = arith.constant dense<0.000000e+00> : vector<1xf32>
    %108 = vector.multi_reduction <add>, %107, %cst_47 [0] : vector<32x1xf32> to vector<1xf32>
    %109 = vector.shape_cast %108 : vector<1xf32> to vector<1x1xf32>
    %110 = tpu.reciprocal %109 {approx = true} : vector<1x1xf32> -> vector<1x1xf32>
    %111 = vector.broadcast %110 : vector<1x1xf32> to vector<32x32xf32>
    %112 = arith.mulf %105, %111 : vector<32x32xf32>
    %113 = math.log %109 : vector<1x1xf32>
    %114 = vector.broadcast %113 : vector<1x1xf32> to vector<32x32xf32>
    %115 = arith.subf %104, %114 : vector<32x32xf32>
    %116 = vector.broadcast %98 : vector<1x1xf32> to vector<32x32xf32>
    %117 = arith.subf %92, %116 : vector<32x32xf32>
    %118 = arith.subf %115, %117 : vector<32x32xf32>
    %119 = arith.mulf %112, %118 : vector<32x32xf32>
    %120 = vector.shape_cast %119 : vector<32x32xf32> to vector<1x32x32xf32>
    %cst_48 = arith.constant dense<0.000000e+00> : vector<1xf32>
    %121 = vector.multi_reduction <add>, %120, %cst_48 [1, 2] : vector<1x32x32xf32> to vector<1xf32>
    %122 = vector.shape_cast %121 : vector<1xf32> to vector<1x1x1xf32>
    %123 = vector.extract %122[0, 0, 0] : f32 from vector<1x1x1xf32>
    %c0_49 = arith.constant 0 : index
    %124 = memref.load %arg11[%c0_49] : memref<3xf32, #tpu.memory_space<smem>>
    %125 = vector.shape_cast %54 : vector<16x16xf32> to vector<1x16x16xf32>
    %cst_50 = arith.constant dense<0.000000e+00> : vector<1xf32>
    %126 = vector.multi_reduction <add>, %125, %cst_50 [1, 2] : vector<1x16x16xf32> to vector<1xf32>
    %127 = vector.shape_cast %126 : vector<1xf32> to vector<1x1x1xf32>
    %128 = vector.extract %127[0, 0, 0] : f32 from vector<1x1x1xf32>
    %129 = arith.addf %124, %128 : f32
    %c0_51 = arith.constant 0 : index
    %130 = memref.load %arg11[%c0_51] : memref<3xf32, #tpu.memory_space<smem>>
    memref.store %129, %arg11[%c0_51] : memref<3xf32, #tpu.memory_space<smem>>
    %c1_52 = arith.constant 1 : index
    %131 = memref.load %arg11[%c1_52] : memref<3xf32, #tpu.memory_space<smem>>
    %132 = arith.addf %131, %76 : f32
    %c1_53 = arith.constant 1 : index
    %133 = memref.load %arg11[%c1_53] : memref<3xf32, #tpu.memory_space<smem>>
    memref.store %132, %arg11[%c1_53] : memref<3xf32, #tpu.memory_space<smem>>
    %c2_54 = arith.constant 2 : index
    %134 = memref.load %arg11[%c2_54] : memref<3xf32, #tpu.memory_space<smem>>
    %135 = arith.addf %134, %123 : f32
    %c2_55 = arith.constant 2 : index
    %136 = memref.load %arg11[%c2_55] : memref<3xf32, #tpu.memory_space<smem>>
    memref.store %135, %arg11[%c2_55] : memref<3xf32, #tpu.memory_space<smem>>
    %c1_i32 = arith.constant 1 : i32
    %137 = arith.cmpi eq, %arg0, %c1_i32 : i32
    %138 = arith.extui %137 : i1 to i32
    %c0_i32_56 = arith.constant 0 : i32
    %139 = arith.cmpi ne, %138, %c0_i32_56 : i32
    scf.if %139 {
      %c0_57 = arith.constant 0 : index
      %140 = memref.load %arg11[%c0_57] : memref<3xf32, #tpu.memory_space<smem>>
      %cst_58 = arith.constant 0.001953125 : f32
      %141 = arith.mulf %140, %cst_58 : f32
      %c1_59 = arith.constant 1 : index
      %142 = memref.load %arg11[%c1_59] : memref<3xf32, #tpu.memory_space<smem>>
      %cst_60 = arith.constant 5.000000e-01 : f32
      %143 = arith.mulf %142, %cst_60 : f32
      %144 = arith.addf %141, %143 : f32
      %c0_61 = arith.constant 0 : index
      %145 = memref.load %arg10[%c0_61] : memref<2xf32, #tpu.memory_space<smem>>
      memref.store %144, %arg10[%c0_61] : memref<2xf32, #tpu.memory_space<smem>>
      %c2_62 = arith.constant 2 : index
      %146 = memref.load %arg11[%c2_62] : memref<3xf32, #tpu.memory_space<smem>>
      %cst_63 = arith.constant 1.000000e-01 : f32
      %147 = arith.mulf %cst_63, %146 : f32
      %cst_64 = arith.constant 5.000000e-01 : f32
      %148 = arith.mulf %147, %cst_64 : f32
      %c1_65 = arith.constant 1 : index
      %149 = memref.load %arg10[%c1_65] : memref<2xf32, #tpu.memory_space<smem>>
      memref.store %148, %arg10[%c1_65] : memref<2xf32, #tpu.memory_space<smem>>
    } else {
    }
    return
  }
  func.func @transform_0(%arg0: i32) -> i32 {
    %c0_i32 = arith.constant 0 : i32
    %c0_i32_0 = arith.constant 0 : i32
    return %c0_i32 : i32
  }
  func.func @transform_1(%arg0: i32) -> i32 {
    %c0_i32 = arith.constant 0 : i32
    %c0_i32_0 = arith.constant 0 : i32
    return %c0_i32 : i32
  }
  func.func @transform_2(%arg0: i32) -> i32 {
    %c0_i32 = arith.constant 0 : i32
    %c0_i32_0 = arith.constant 0 : i32
    return %c0_i32 : i32
  }
  func.func @transform_3(%arg0: i32) -> i32 {
    %c0_i32 = arith.constant 0 : i32
    %c0_i32_0 = arith.constant 0 : i32
    return %c0_i32 : i32
  }
  func.func @transform_4(%arg0: i32) -> (i32, i32, i32) {
    %c0_i32 = arith.constant 0 : i32
    %c0_i32_0 = arith.constant 0 : i32
    %c0_i32_1 = arith.constant 0 : i32
    return %arg0, %c0_i32, %c0_i32_0 : i32, i32, i32
  }
  func.func @transform_5(%arg0: i32) -> (i32, i32, i32) {
    %c0_i32 = arith.constant 0 : i32
    %c0_i32_0 = arith.constant 0 : i32
    %c0_i32_1 = arith.constant 0 : i32
    return %arg0, %c0_i32, %c0_i32_0 : i32, i32, i32
  }
  func.func @transform_6(%arg0: i32) -> (i32, i32, i32) {
    %c0_i32 = arith.constant 0 : i32
    %c0_i32_0 = arith.constant 0 : i32
    %c0_i32_1 = arith.constant 0 : i32
    return %arg0, %c0_i32, %c0_i32_0 : i32, i32, i32
  }
  func.func @transform_7(%arg0: i32) -> (i32, i32) {
    %c0_i32 = arith.constant 0 : i32
    %c0_i32_0 = arith.constant 0 : i32
    %c0_i32_1 = arith.constant 0 : i32
    return %c0_i32, %c0_i32_0 : i32, i32
  }
  func.func @transform_8(%arg0: i32) -> (i32, i32) {
    %c0_i32 = arith.constant 0 : i32
    %c0_i32_0 = arith.constant 0 : i32
    %c0_i32_1 = arith.constant 0 : i32
    return %c0_i32, %c0_i32_0 : i32, i32
  }
  func.func @transform_9(%arg0: i32) -> i32 {
    %c0_i32 = arith.constant 0 : i32
    %c0_i32_0 = arith.constant 0 : i32
    return %c0_i32 : i32
  }
}

</mosaic_0001>

<bundles_post_ra>
// kernel: tpu_custom_call.1
= control target key start
LH: loop header
LB: loop body
LE: loop exit
PB: predicated region body
PF: predicated region fallthrough
CT: control target
= control target key end

     0   :  { %s1492_s0 = inlined_call_operand.vmem [shape: f32[3], index: 0, kind: input, shape index: {}]   ;;  %s1493_s1 = inlined_call_operand.<no memory space> [shape: f32[1], index: 1, kind: input, shape index: {}]   ;;  %s1494_s2 = inlined_call_operand.vmem [shape: f32[3], index: 2, kind: input, shape index: {}]   ;;  %s1495_s3 = inlined_call_operand.<no memory space> [shape: f32[1], index: 3, kind: input, shape index: {}]   ;;  %s1496_s4 = inlined_call_operand.vmem [shape: f32[2,48,16], index: 4, kind: input, shape index: {}]   ;;  %s1497_s5 = inlined_call_operand.vmem [shape: f32[2,96,32], index: 5, kind: input, shape index: {}]   ;;  %s1498_s6 = inlined_call_operand.vmem [shape: f32[2,16,16], index: 6, kind: input, shape index: {}]   ;;  %s1499_s7 = inlined_call_operand.vmem [shape: bf16[16,32], index: 7, kind: input, shape index: {}]   ;;  %s1500_s8 = inlined_call_operand.vmem [shape: bf16[32,16], index: 8, kind: input, shape index: {}]   ;;  %s1501_s9 = inlined_call_operand.hbm [shape: f32[2], index: 9, kind: output, shape index: {}]  }
   0x1   :  { %14 = sst [smem:[#allocation3]] %s1493_s1 }
   0x2   :  { %15 = sst [smem:[#allocation4]] %s1495_s3 }
   0x3   :  { %16 = vsyncpa [#allocation7], 0 }
   0x4   :  { %17 = vsyncpa [#allocation9], 0 }
   0x5   :  { %18 = vsyncpa [#allocation6], 0  ;;  %s1237_s13 = smov 0  }
   0x6 LB: > { %s1243_s14 = sadd.s32 4294967295, %s1173_s13   ;;  %p965_p0 = scmp.ge.s32.totalorder %s1173_s13, 1  ;;  %s1173_s13 = sphi %s1237_s13, %s24_s13  }
   0x7   : > { %p254_p1 = scmp.lt.s32.totalorder %s1173_s13, 3  ;;  %s267_s15 = sshll.u32 %s1492_s0, 4  ;;  %s268_s15 = int_to_ptr.vmem [resolvable:$true] %s267_s15 }
   0x8   : > { %p1502_p3 = scmp.eq.s32.totalorder %s1243_s14, 0  ;;  %s281_s19 = sshll.u32 %s1494_s2, 4  ;;  %s282_s19 = int_to_ptr.vmem [resolvable:$true] %s281_s19 }
   0x9   : > { %p1250_p2 = pnand %p965_p0, %p254_p1  ;;  %s1113_s21 = scalar_lea.vmem %s268_s15, 16 }
   0xa   : > { %p1114_p6 = scmp.ne.s32.totalorder %s268_s15, %s1113_s21  ;;  %p1121_p10 = scmp.lt.s32.totalorder %s268_s15, %s268_s15 }
   0xb   : > { %s1504_s16 = scalar_select %p1250_p2, 1, 0 }
   0xc   : > { %p1045_p4 = pneg %p1250_p2  ;;  %p1122_p11 = scmp.lt.s32.totalorder %s1113_s21, %s1113_s21 }
   0xe   : > { %p1262_p5 = pnand %p1502_p3, %p1045_p4  ;;  %p1123_p12 = por %p1122_p11, %p1121_p10 }
  0x10   : > { %p1115_p7 = pneg %p1262_p5 }
  0x12   : > { %p1116_p8 = pnand %p1115_p7, %p1114_p6 }
  0x14   : > { %p1117_p9 = pneg %p1116_p8 }
  0x16   : > { %p1124_p13 = pnand %p1123_p12, %p1117_p9 }
  0x18   : > { %1127 = shalt.err (!%p1124_p13)
}
  0x19   : > { %s1175_s22 = smov [#allocation5]   ;;  %s1128_s23 = scalar_lea.vmem %s282_s19, 16 }
  0x1a   : > { %1048 = dma.vmem_to_smem (!%p1262_p5), %s268_s15, 16, %s1175_s22, [#allocation7]  }
  0x1b   : > { %p1129_p0 = scmp.ne.s32.totalorder %s282_s19, %s1128_s23  ;;  %p1136_p3 = scmp.lt.s32.totalorder %s282_s19, %s282_s19 }
  0x1c   : > { %p1137_p2 = scmp.lt.s32.totalorder %s1128_s23, %s1128_s23 }
  0x1d   : > { %p1131_p1 = pnand %p1129_p0, %p1115_p7 }
  0x1e   : > { %p1138_p6 = por %p1137_p2, %p1136_p3 }
  0x1f   : > { %p1132_p4 = pneg %p1131_p1 }
  0x21   : > { %p1139_p8 = pnand %p1138_p6, %p1132_p4 }
  0x23   : > { %1142 = shalt.err (!%p1139_p8)
}
  0x24   : > { %s1176_s24 = smov [#allocation8]   ;;  %p1506_p9 = scmp.ne.s32.totalorder %s1504_s16, 0 }
  0x25   : > { %1051 = dma.vmem_to_smem (!%p1262_p5), %s282_s19, 16, %s1176_s24, [#allocation9]  }
  0x26   : > { %327 = sbr.rel (%p1506_p9) target bundleno = 1102 (0x44e), region = 56  ;;  %p1507_p10 = scmp.eq.s32.totalorder (!%p1506_p9), %s1243_s14, 0 }
  0x2d   : > { %1160 = dma.done.wait (%p1507_p10), [#allocation7], 16   ;;  %p1508_p11 = pmov %p1507_p10 }
  0x2e   : > { %p1509_p7 = pmov %p1507_p10 }
  0x2f   : > { %1162 = vsyncadd (%p1508_p11), [#allocation7], 4294967280 }
  0x30   : > { %1164 = dma.done.wait (%p1509_p7), [#allocation9], 16   ;;  %p1510_p2 = pmov %p1509_p7 }
  0x32   : > { %1166 = vsyncadd (%p1510_p2), [#allocation9], 4294967280 }
  0x33   : > { %337 = sfence }
  0x34   : > { %v1074_v0 = vld [vmem:[%s1499_s7] sm:$0xff]   ;;  %v1177_v1 = vmov 0.0   ;;  %p373_p3 = scmp.lt.s32.totalorder %s1243_s14, 1  ;;  %s401_s27 = sld [smem:[#allocation5]]  ;;  %vm1178_vm0 = vmmov 0   ;;  %vm517_vm1 = vcmask 130048  }
  0x35   : > { %1002 = vmatprep.subr.bf16.mxu0 %v1177_v1  ;;  %1004 = vmatprep.mubr.msk.bf16.mxu0 %vm1178_vm0, %v1177_v1  ;;  %s977_s28 = sld [smem:[#allocation5 + $0x1]]  ;;  %s978_s29 = sld [smem:[#allocation5 + $0x2]]  ;;  %v1075_v25 = vld [vmem:[%s1500_s8] sm:$0xff]   ;;  %vm683_vm2 = vcmask 261120   ;;  %v1076_v46 = vld [vmem:[%s1500_s8 + $0x8] sm:$0xff]  }
  0x36   : > { %1003 = vmatpush3.bf16.msra.mxu0 %v1074_v0  ;;  %s1287_s30 = scalar_select %p373_p3, %s1243_s14, 1  ;;  %1010 = vmatprep.mubr.msk.bf16.mxu1 %vm517_vm1, %v1075_v25 }
  0x37   : > { %s421_s10 = sld [smem:[#allocation3]]  ;;  %s979_s22 = sld [smem:[#allocation8 + $0x1]] }
  0x38   : > { %s1014_s11 = smul.u32 48, %s1287_s30  ;;  %s429_s18 = sld [smem:[#allocation8]] }
  0x39   : > { %s1015_s15 = smul.u32 96, %s1287_s30  ;;  %s980_s23 = sld [smem:[#allocation8 + $0x2]] }
  0x3a   : > { %s377_s3 = scalar_lea.vmem %s1496_s4, %s1014_s11  ;;  %v402_v2 = vstv %s401_s27  ;;  %s463_s24 = sld [smem:[#allocation4]] }
  0x3b   : > { %v399_v3 = vld [vmem:[%s377_s3] sm:$0xff]  ;;  %v400_v4 = vld [vmem:[%s377_s3 + $0x8] sm:$0xff]  ;;  %v405_v5 = vld [vmem:[%s377_s3 + $0x10] sm:$0xff]  ;;  %v408_v6 = vstv %s977_s28  ;;  %s1308_s21 = scalar_lea.vmem %s1497_s5, %s1015_s15  ;;  %s996_s27 = sshll.u32 %s1287_s30, 4 }
  0x3c   : > { %v403_v7 = vmul.f32 %v402_v2, %v399_v3  ;;  %v404_v8 = vmul.f32 %v402_v2, %v400_v4  ;;  %v406_v9 = vld [vmem:[%s377_s3 + $0x18] sm:$0xff]  ;;  %v409_v10 = vmul.f32 %v408_v6, %v405_v5  ;;  %v413_v11 = vld [vmem:[%s377_s3 + $0x20] sm:$0xff]  ;;  %v414_v12 = vld [vmem:[%s377_s3 + $0x28] sm:$0xff]  ;;  %v416_v13 = vstv %s978_s29  ;;  %s1179_s30 = smov 0.0   ;;  %p1511_p5 = pmov %p1510_p2 }
  0x3d   : > { %v410_v14 = vmul.f32 %v408_v6, %v406_v9  ;;  %v417_v15 = vmul.f32 %v416_v13, %v413_v11  ;;  %v418_v16 = vmul.f32 %v416_v13, %v414_v12  ;;  %v422_v19 = vstv %s421_s10  ;;  %v426_v26 = vld [vmem:[%s1308_s21 + $0x8] sm:$0xff]  ;;  %v425_v47 = vld [vmem:[%s1308_s21] sm:$0xff]  ;;  %v428_v58 = vld [vmem:[%s1308_s21 + $0x18] sm:$0xff]  ;;  %s387_s10 = scalar_lea.vmem %s1498_s6, %s996_s27  ;;  %p1512_p12 = pmov %p1510_p2 }
  0x3e   : > { %v411_v17 = vadd.f32 %v409_v10, %v403_v7  ;;  %v436_v27 = vld [vmem:[%s1308_s21 + $0x28] sm:$0xff]  ;;  %v430_v28 = vstv %s429_s18  ;;  %v440_v31 = vstv %s979_s22  ;;  %v435_v48 = vld [vmem:[%s1308_s21 + $0x20] sm:$0xff]  ;;  %1036 = sst [smem:[#allocation2 + $0x1]] (%p1511_p5), %s1179_s30  ;;  %p1513_p13 = pmov %p1510_p2 }
  0x3f   : > { %v412_v18 = vadd.f32 %v410_v14, %v404_v8  ;;  %v450_v29 = vld [vmem:[%s1308_s21 + $0x48] sm:$0xff]  ;;  %v432_v30 = vmul.f32 %v430_v28, %v426_v26  ;;  %v442_v32 = vmul.f32 %v440_v31, %v436_v27  ;;  %v454_v33 = vstv %s980_s23  ;;  %v449_v51 = vld [vmem:[%s1308_s21 + $0x40] sm:$0xff]  ;;  %v438_v59 = vld [vmem:[%s1308_s21 + $0x38] sm:$0xff]  ;;  %1037 = sst [smem:[#allocation2 + $0x2]] (%p1512_p12), %s1179_s30  ;;  %s987_s16 = sld [smem:[#allocation2 + $0x1]] }
  0x40   : > { %v419_v20 = vadd.f32 %v417_v15, %v411_v17  ;;  %v456_v34 = vmul.f32 %v454_v33, %v450_v29  ;;  %v464_v36 = vstv %s463_s24  ;;  %v431_v49 = vmul.f32 %v430_v28, %v425_v47  ;;  %v427_v60 = vld [vmem:[%s1308_s21 + $0x10] sm:$0xff]  ;;  %v452_v0 = vld [vmem:[%s1308_s21 + $0x58] sm:$0xff]  ;;  %1035 = sst [smem:[#allocation2]] (%p1513_p13), %s1179_s30  ;;  %p1057_p0 = scmp.eq.s32.totalorder %s1243_s14, 1 }
  0x41   : > { %v420_v21 = vadd.f32 %v418_v16, %v412_v18  ;;  %v446_v35 = vadd.f32 %v442_v32, %v432_v30  ;;  %v441_v50 = vmul.f32 %v440_v31, %v435_v48  ;;  %v455_v53 = vmul.f32 %v454_v33, %v449_v51  ;;  %v437_v61 = vld [vmem:[%s1308_s21 + $0x30] sm:$0xff]  ;;  %s833_s22 = sld [smem:[#allocation2]] }
  0x42   : > { %v1293_v22 = vadd.f32 %v422_v19, %v419_v20  ;;  %v434_v62 = vmul.f32 %v430_v28, %v428_v58  ;;  %v444_v63 = vmul.f32 %v440_v31, %v438_v59  ;;  %v433_v1 = vmul.f32 %v430_v28, %v427_v60  ;;  %v451_v3 = vld [vmem:[%s1308_s21 + $0x50] sm:$0xff]  ;;  %s988_s21 = sld [smem:[#allocation2 + $0x2]] }
  0x43   : > { %v1295_v23 = vadd.f32 %v422_v19, %v420_v21  ;;  %v460_v37 = vadd.f32 %v456_v34, %v446_v35  ;;  %v445_v52 = vadd.f32 %v441_v50, %v431_v49  ;;  %v443_v2 = vmul.f32 %v440_v31, %v437_v61 }
  0x44   : > { %v448_v4 = vadd.f32 %v444_v63, %v434_v62  ;;  %v458_v5 = vmul.f32 %v454_v33, %v452_v0  ;;  %v457_v7 = vmul.f32 %v454_v33, %v451_v3  ;;  %v471_v32 = vand.u32 2147483647, %v1293_v22 }
  0x45   : > { %v552_v24 = vpack.c.bf16 %v1295_v23, %v1293_v22  ;;  %v466_v38 = vadd.f32 %v464_v36, %v460_v37  ;;  %v459_v54 = vadd.f32 %v455_v53, %v445_v52  ;;  %v447_v6 = vadd.f32 %v443_v2, %v433_v1 }
  0x46   : > { %v462_v8 = vadd.f32 %v458_v5, %v448_v4  ;;  %v472_v33 = vand.u32 2147483647, %v1295_v23  ;;  %v473_v35 = vsub.f32 0.0, %v471_v32  ;;  %vm509_vm3 = vcmp.ge.f32.partialorder %v1293_v22, 0.0 }
  0x47   : > { %1005 = vmatmul.mubr.msk.bf16.vlgmr.msra.gmra.mrb[0].mxu0 %vm517_vm1, %v552_v24  ;;  %v1313_v39 = vmul.f32 0.5, %v466_v38  ;;  %v465_v55 = vadd.f32 %v464_v36, %v459_v54  ;;  %v461_v9 = vadd.f32 %v457_v7, %v447_v6  ;;  %vm510_vm4 = vcmp.ge.f32.partialorder %v1295_v23, 0.0 }
  0x48   : > { %v468_v13 = vadd.f32 %v464_v36, %v462_v8  ;;  %v474_v37 = vsub.f32 0.0, %v472_v33 }
  0x49   : > { %v743_v40 = vsel %vm683_vm2, %v1313_v39, -inf  ;;  %v1324_v56 = vmul.f32 0.5, %v465_v55  ;;  %v467_v16 = vadd.f32 %v464_v36, %v461_v9 }
  0x4a   : > { %744 = vmax.xlane.f32.xlu1 %v743_v40  ;;  %v1341_v24 = vmul.f32 0.5, %v468_v13  ;;  %v475_v40 = vmul.f32 1.442695, %v473_v35 }
  0x4b   : > { %v740_v57 = vsel %vm683_vm2, %v1324_v56, -inf  ;;  %v681_v25 = vmul.f32 0.5, %v467_v16 }
  0x4c   : > { %741 = vmax.xlane.f32.xlu0 %v740_v57  ;;  %v749_v28 = vsel %vm683_vm2, %v1341_v24, -inf  ;;  %1077 = vpow2.f32 %v475_v40 }
  0x4d   : > { %v746_v29 = vsel %vm683_vm2, %v681_v25, -inf }
  0x56   : > { %v1351_v60 = vpop.eup %1077 }
  0x57   : > { %v1356_v1 = vadd.f32 1.0, %v1351_v60 }
  0xd7   : > { %v745_v30 = vpop.xlane.xlu1 %744 }
  0xd9   : > { %v742_v31 = vpop.xlane.xlu0 %741 }
  0xda   : > { %v752_v48 = vmax.f32 %v742_v31, %v745_v30  ;;  %v469_v30 = vld [vmem:[%s387_s10] sm:$0xff]  ;;  %v470_v31 = vld [vmem:[%s387_s10 + $0x8] sm:$0xff] }
 0x11a   : > { %v598_v41 = vpop.f32.mrb[0].mxu0 }
 0x11b   : > { %v1006_v42 = vpop.f32.mrb[1].mxu0 }
 0x11c   : > { %v601_v43 = vpop.f32.mrb[2].mxu0 }
 0x11d   : > { %v609_v44 = vpack.c.bf16 %v601_v43, %v598_v41  ;;  %v1007_v45 = vpop.f32.mrb[3].mxu0  ;;  %v477_v43 = vmul.f32 1.442695, %v474_v37 }
 0x11f   : > { %1008 = vmatprep.subr.bf16.mxu1 %v609_v44  ;;  %1079 = vpow2.f32 %v477_v43 }
 0x120   : > { %1009 = vmatpush3.bf16.msra.mxu1 %v609_v44  ;;  %1081 = vrcp.f32 %v1356_v1 }
 0x123   : > { %1011 = vmatmul.mubr.msk.bf16.vlgmr.msra.gmra.mrb[0].mxu1 %vm517_vm1, %v1076_v46 }
 0x129   : > { %v1353_v61 = vpop.eup %1079 }
 0x12a   : > { %v1359_v2 = vadd.f32 1.0, %v1353_v61 }
 0x12c   : > { %1083 = vrcp.f32 %v1359_v2 }
 0x1f6   : > { %v1012_v10 = vpop.f32.mrb[0].mxu1 }
 0x1f7   : > { %v1334_v11 = vmul.f32 0.5, %v1012_v10  ;;  %v660_v12 = vpop.f32.mrb[1].mxu1 }
 0x1f8   : > { %v675_v14 = vmul.f32 0.5, %v660_v12  ;;  %v1013_v15 = vpop.f32.mrb[2].mxu1 }
 0x1f9   : > { %v1336_v17 = vmul.f32 0.5, %v1013_v15  ;;  %v663_v18 = vpop.f32.mrb[3].mxu1  ;;  %v690_v19 = vsel %vm683_vm2, %v1334_v11, -inf }
 0x1fa   : > { %v676_v20 = vmul.f32 0.5, %v663_v18  ;;  %691 = vmax.xlane.f32.xlu1 %v690_v19  ;;  %v684_v21 = vsel %vm683_vm2, %v675_v14, -inf  ;;  %v1082_v18 = vpop.eup %1081 }
 0x1fb   : > { %685 = vmax.xlane.f32.xlu0 %v684_v21  ;;  %v693_v26 = vsel %vm683_vm2, %v1336_v17, -inf }
 0x1fc   : > { %v687_v27 = vsel %vm683_vm2, %v676_v20, -inf }
 0x1fe   : > { %694 = vmax.xlane.f32.xlu1 %v693_v26 }
 0x1ff   : > { %688 = vmax.xlane.f32.xlu0 %v687_v27 }
 0x202   : > { %750 = vmax.xlane.f32.xlu1 %v749_v28 }
 0x203   : > { %747 = vmax.xlane.f32.xlu0 %v746_v29 }
 0x287   : > { %v692_v34 = vpop.xlane.xlu1 %691 }
 0x288   : > { %v686_v36 = vpop.xlane.xlu0 %685 }
 0x28b   : > { %v695_v38 = vpop.xlane.xlu1 %694 }
 0x28c   : > { %v697_v41 = vmax.f32 %v692_v34, %v695_v38  ;;  %v689_v42 = vpop.xlane.xlu0 %688 }
 0x28d   : > { %v696_v44 = vmax.f32 %v686_v36, %v689_v42 }
 0x28f   : > { %v698_v45 = vmax.f32 %v696_v44, %v697_v41  ;;  %v751_v46 = vpop.xlane.xlu1 %750 }
 0x290   : > { %v748_v47 = vpop.xlane.xlu0 %747 }
 0x291   : > { %v699_v49 = vrot.slane %v698_v45, 4  ;;  %v753_v50 = vmax.f32 %v748_v47, %v751_v46 }
 0x293   : > { %v700_v51 = vmax.f32 %v698_v45, %v699_v49  ;;  %v754_v52 = vmax.f32 %v752_v48, %v753_v50 }
 0x295   : > { %v701_v53 = vrot.slane %v700_v51, 2  ;;  %v755_v54 = vrot.slane %v754_v52, 4 }
 0x297   : > { %v702_v55 = vmax.f32 %v700_v51, %v701_v53  ;;  %v756_v57 = vmax.f32 %v754_v52, %v755_v54 }
 0x299   : > { %v703_v58 = vrot.slane %v702_v55, 1  ;;  %v757_v59 = vrot.slane %v756_v57, 2 }
 0x29b   : > { %v758_v62 = vmax.f32 %v756_v57, %v757_v59  ;;  %v704_v63 = vmax.f32 %v702_v55, %v703_v58  ;;  %v488_v55 = vmul.f32 -0.5, %v1351_v60  ;;  %v497_v57 = vmul.f32 -0.5, %v1353_v61 }
 0x29c   : > { %v479_v58 = vmax.f32 %v1293_v22, 0.0  ;;  %v480_v59 = vmax.f32 %v1295_v23, 0.0 }
 0x29d   : > { %v759_v0 = vrot.slane %v758_v62, 1  ;;  %v1361_v4 = vsub.f32 %v675_v14, %v704_v63  ;;  %v1376_v12 = vsub.f32 %v676_v20, %v704_v63  ;;  %v1388_v16 = vsub.f32 %v1336_v17, %v704_v63 }
 0x29f   : > { %v760_v3 = vmax.f32 %v758_v62, %v759_v0  ;;  %v711_v13 = vmul.f32 1.442695, %v1376_v12  ;;  %v715_v20 = vmul.f32 1.442695, %v1388_v16  ;;  %v481_v62 = vmul.f32 %v469_v30, %v1293_v22 }
 0x2a1   : > { %v1364_v5 = vsub.f32 %v1313_v39, %v760_v3  ;;  %v1367_v6 = vsub.f32 %v1324_v56, %v760_v3  ;;  %v1369_v7 = vsub.f32 %v681_v25, %v760_v3  ;;  %v709_v39 = vmul.f32 1.442695, %v1361_v4 }
 0x2a2   : > { %v1380_v56 = vsub.f32 %v1334_v11, %v704_v63  ;;  %v1384_v14 = vsub.f32 %v1341_v24, %v760_v3  ;;  %v1084_v11 = vpop.eup %1083  ;;  %v511_v24 = vmul.f32 %v1082_v18, %v1351_v60  ;;  %v482_v63 = vmul.f32 %v470_v31, %v1295_v23 }
 0x2a3   : > { %v767_v8 = vmul.f32 1.442695, %v1364_v5  ;;  %v765_v9 = vmul.f32 1.442695, %v1367_v6  ;;  %v769_v10 = vmul.f32 1.442695, %v1369_v7  ;;  %v512_v25 = vmul.f32 %v1084_v11, %v1353_v61 }
 0x2a4   : > { %v713_v15 = vmul.f32 1.442695, %v1380_v56  ;;  %v771_v19 = vmul.f32 1.442695, %v1384_v14  ;;  %v513_v32 = vsel %vm509_vm3, %v1082_v18, %v511_v24  ;;  %v489_v3 = vadd.f32 1.0, %v488_v55 }
 0x2a5   : > { %1085 = vpow2.f32 %v767_v8  ;;  %v514_v33 = vsel %vm510_vm4, %v1084_v11, %v512_v25  ;;  %v530_v38 = vadd.f32 %v513_v32, %v469_v30  ;;  %v515_v41 = vmul.f32 %v513_v32, %v469_v30 }
 0x2a6   : > { %1087 = vpow2.f32 %v765_v9  ;;  %v531_v40 = vadd.f32 %v514_v33, %v470_v31  ;;  %v516_v42 = vmul.f32 %v514_v33, %v470_v31  ;;  %v491_v8 = vand.u32 2147483647, %v1351_v60 }
 0x2a7   : > { %1089 = vpow2.f32 %v769_v10  ;;  %v532_v47 = vsel %vm517_vm1, %v530_v38, 0.0  ;;  %v518_v49 = vsel %vm517_vm1, %v515_v41, 0.0  ;;  %v498_v9 = vadd.f32 1.0, %v497_v57 }
 0x2a8   : > { %1091 = vpow2.f32 %v709_v39  ;;  %v533_v48 = vsel %vm517_vm1, %v531_v40, 0.0  ;;  %v519_v50 = vsel %vm517_vm1, %v516_v42, 0.0  ;;  %v483_v10 = vsub.f32 %v479_v58, %v481_v62 }
 0x2a9   : > { %1093 = vpow2.f32 %v711_v13  ;;  %v534_v53 = vadd.f32 %v533_v48, %v532_v47  ;;  %v520_v54 = vadd.f32 %v519_v50, %v518_v49  ;;  %v484_v39 = vsub.f32 %v480_v59, %v482_v63 }
 0x2aa   : > { %1095 = vpow2.f32 %v713_v15  ;;  %v490_v15 = vmul.f32 %v1351_v60, %v489_v3  ;;  %vm492_vm5 = vcmp.lt.f32.partialorder %v491_v8, 0.0004427343  ;;  %v499_v23 = vmul.f32 %v1353_v61, %v498_v9 }
 0x2ab   : > { %1097 = vpow2.f32 %v771_v19 }
 0x2ac   : > { %1099 = vpow2.f32 %v715_v20 }
 0x2ad   : > { %1101 = vlog2.f32 %v1356_v1  ;;  %v500_v1 = vand.u32 2147483647, %v1353_v61 }
 0x2ae   : > { %1103 = vlog2.f32 %v1359_v2 }
 0x2af   : > { %v1393_v21 = vpop.eup %1085  ;;  %vm501_vm6 = vcmp.lt.f32.partialorder %v500_v1, 0.0004427343 }
 0x2b0   : > { %v1397_v26 = vpop.eup %1087  ;;  %v776_v17 = vsel %vm683_vm2, %v1393_v21, 0.0 }
 0x2b1   : > { %v1406_v27 = vpop.eup %1089  ;;  %777 = vadd.xlane.f32.xlu1 %v776_v17  ;;  %v773_v28 = vsel %vm683_vm2, %v1397_v26, 0.0 }
 0x2b2   : > { %v1092_v29 = vpop.eup %1091  ;;  %774 = vadd.xlane.f32.xlu0 %v773_v28  ;;  %v779_v34 = vsel %vm683_vm2, %v1406_v27, 0.0 }
 0x2b3   : > { %v1094_v35 = vpop.eup %1093  ;;  %v717_v36 = vsel %vm683_vm2, %v1092_v29, 0.0 }
 0x2b4   : > { %v1096_v37 = vpop.eup %1095  ;;  %v720_v43 = vsel %vm683_vm2, %v1094_v35, 0.0 }
 0x2b5   : > { %780 = vadd.xlane.f32.xlu1 %v779_v34  ;;  %v1414_v44 = vpop.eup %1097  ;;  %v723_v45 = vsel %vm683_vm2, %v1096_v37, 0.0 }
 0x2b6   : > { %718 = vadd.xlane.f32.xlu0 %v717_v36  ;;  %v1100_v46 = vpop.eup %1099  ;;  %v782_v51 = vsel %vm683_vm2, %v1414_v44, 0.0 }
 0x2b7   : > { %v726_v52 = vsel %vm683_vm2, %v1100_v46, 0.0  ;;  %v1102_v0 = vpop.eup %1101 }
 0x2b8   : > { %v1104_v2 = vpop.eup %1103  ;;  %v487_v13 = vmul.f32 0.6931472, %v1102_v0 }
 0x2b9   : > { %721 = vadd.xlane.f32.xlu1 %v720_v43  ;;  %v496_v22 = vmul.f32 0.6931472, %v1104_v2 }
 0x2ba   : > { %724 = vadd.xlane.f32.xlu0 %v723_v45  ;;  %v493_v18 = vsel %vm492_vm5, %v490_v15, %v487_v13 }
 0x2bb   : > { %v502_v19 = vsel %vm501_vm6, %v499_v23, %v496_v22  ;;  %v503_v11 = vadd.f32 %v493_v18, %v483_v10 }
 0x2bc   : > { %v504_v20 = vadd.f32 %v502_v19, %v484_v39 }
 0x2bd   : > { %783 = vadd.xlane.f32.xlu1 %v782_v51  ;;  %v834_v24 = vsel %vm517_vm1, %v503_v11, 0.0 }
 0x2be   : > { %727 = vadd.xlane.f32.xlu0 %v726_v52  ;;  %v835_v25 = vsel %vm517_vm1, %v504_v20, 0.0 }
 0x2bf   : > { %v836_v17 = vadd.f32 %v835_v25, %v834_v24 }
 0x2c1   : > { %535 = vadd.xlane.f32.xlu1 %v534_v53 }
 0x2c2   : > { %521 = vadd.xlane.f32.xlu0 %v520_v54 }
 0x2c5   : > { %837 = vadd.xlane.f32.xlu1 %v836_v17 }
 0x33e   : > { %v778_v60 = vpop.xlane.xlu1 %777 }
 0x33f   : > { %v775_v61 = vpop.xlane.xlu0 %774 }
 0x340   : > { %v785_v31 = vadd.f32 %v778_v60, %v775_v61 }
 0x342   : > { %v781_v28 = vpop.xlane.xlu1 %780 }
 0x343   : > { %v719_v29 = vpop.xlane.xlu0 %718  ;;  %v786_v34 = vadd.f32 %v785_v31, %v781_v28 }
 0x346   : > { %v722_v30 = vpop.xlane.xlu1 %721 }
 0x347   : > { %v729_v32 = vadd.f32 %v722_v30, %v719_v29  ;;  %v725_v33 = vpop.xlane.xlu0 %724 }
 0x349   : > { %v730_v35 = vadd.f32 %v729_v32, %v725_v33 }
 0x34a   : > { %v784_v36 = vpop.xlane.xlu1 %783 }
 0x34b   : > { %v787_v37 = vadd.f32 %v786_v34, %v784_v36  ;;  %v728_v38 = vpop.xlane.xlu0 %727 }
 0x34c   : > { %v731_v40 = vadd.f32 %v730_v35, %v728_v38 }
 0x34d   : > { %v788_v41 = vrot.slane %v787_v37, 4 }
 0x34e   : > { %v732_v42 = vrot.slane %v731_v40, 4  ;;  %v536_v43 = vpop.xlane.xlu1 %535 }
 0x34f   : > { %v789_v45 = vadd.f32 %v788_v41, %v787_v37  ;;  %v537_v46 = vrot.slane %v536_v43, 4  ;;  %v522_v47 = vpop.xlane.xlu0 %521 }
 0x350   : > { %v733_v48 = vadd.f32 %v732_v42, %v731_v40  ;;  %v523_v49 = vrot.slane %v522_v47, 4 }
 0x351   : > { %v790_v50 = vrot.slane %v789_v45, 2  ;;  %v538_v51 = vadd.f32 %v537_v46, %v536_v43 }
 0x352   : > { %v734_v52 = vrot.slane %v733_v48, 2  ;;  %v524_v53 = vadd.f32 %v523_v49, %v522_v47  ;;  %v838_v36 = vpop.xlane.xlu1 %837 }
 0x353   : > { %v791_v54 = vadd.f32 %v790_v50, %v789_v45  ;;  %v539_v55 = vrot.slane %v538_v51, 2  ;;  %v839_v37 = vrot.slane %v838_v36, 4 }
 0x354   : > { %v735_v57 = vadd.f32 %v734_v52, %v733_v48  ;;  %v525_v58 = vrot.slane %v524_v53, 2 }
 0x355   : > { %v792_v59 = vrot.slane %v791_v54, 1  ;;  %v540_v62 = vadd.f32 %v539_v55, %v538_v51  ;;  %v840_v38 = vadd.f32 %v839_v37, %v838_v36 }
 0x356   : > { %v736_v63 = vrot.slane %v735_v57, 1  ;;  %v526_v0 = vadd.f32 %v525_v58, %v524_v53 }
 0x357   : > { %v793_v3 = vadd.f32 %v792_v59, %v791_v54  ;;  %v541_v8 = vrot.slane %v540_v62, 1  ;;  %v841_v40 = vrot.slane %v840_v38, 2 }
 0x358   : > { %v737_v9 = vadd.f32 %v736_v63, %v735_v57  ;;  %v527_v1 = vrot.slane %v526_v0, 1 }
 0x359   : > { %v542_v2 = vadd.f32 %v541_v8, %v540_v62  ;;  %1105 = vlog2.f32 %v793_v3  ;;  %v842_v45 = vadd.f32 %v841_v40, %v840_v38 }
 0x35a   : > { %v528_v10 = vadd.f32 %v527_v1, %v526_v0  ;;  %1107 = vlog2.f32 %v737_v9 }
 0x35b   : > { %1109 = vrcp.f32 %v793_v3  ;;  %v843_v48 = vrot.slane %v842_v45, 1 }
 0x35c   : > { %1016 = vpush %v528_v10 }
 0x35d   : > { %1018 = vpush %v542_v2  ;;  %v844_v51 = vadd.f32 %v843_v48, %v842_v45 }
 0x363   : > { %v1106_v39 = vpop.eup %1105 }
 0x364   : > { %v1108_v13 = vpop.eup %1107  ;;  %v800_v15 = vmul.f32 0.6931472, %v1106_v39 }
 0x365   : > { %v1110_v22 = vpop.eup %1109  ;;  %v739_v23 = vmul.f32 0.6931472, %v1108_v13 }
 0x366   : > { %v801_v18 = vsub.f32 %v1367_v6, %v800_v15  ;;  %v802_v19 = vsub.f32 %v1364_v5, %v800_v15  ;;  %v803_v11 = vsub.f32 %v1369_v7, %v800_v15  ;;  %v804_v20 = vsub.f32 %v1384_v14, %v800_v15 }
 0x367   : > { %v805_v24 = vsub.f32 %v1361_v4, %v739_v23  ;;  %v806_v25 = vsub.f32 %v1376_v12, %v739_v23  ;;  %v807_v17 = vsub.f32 %v1380_v56, %v739_v23  ;;  %v808_v60 = vsub.f32 %v1388_v16, %v739_v23 }
 0x368   : > { %v795_v61 = vmul.f32 %v1110_v22, %v1397_v26  ;;  %v796_v28 = vmul.f32 %v1110_v22, %v1393_v21  ;;  %v797_v6 = vmul.f32 %v1110_v22, %v1406_v27  ;;  %v798_v14 = vmul.f32 %v1110_v22, %v1414_v44 }
 0x369   : > { %v809_v29 = vsub.f32 %v801_v18, %v805_v24  ;;  %v810_v5 = vsub.f32 %v802_v19, %v806_v25  ;;  %v811_v30 = vsub.f32 %v803_v11, %v807_v17  ;;  %v812_v7 = vsub.f32 %v804_v20, %v808_v60 }
 0x36b   : > { %v813_v31 = vmul.f32 %v809_v29, %v795_v61  ;;  %v814_v4 = vmul.f32 %v810_v5, %v796_v28  ;;  %v815_v32 = vmul.f32 %v811_v30, %v797_v6  ;;  %v816_v12 = vmul.f32 %v812_v7, %v798_v14 }
 0x36d   : > { %v817_v56 = vsel %vm683_vm2, %v813_v31, 0.0  ;;  %v818_v16 = vsel %vm683_vm2, %v814_v4, 0.0  ;;  %v820_v26 = vsel %vm683_vm2, %v815_v32, 0.0  ;;  %v822_v27 = vsel %vm683_vm2, %v816_v12, 0.0 }
 0x36e   : > { %v819_v33 = vadd.f32 %v818_v16, %v817_v56 }
 0x370   : > { %v821_v21 = vadd.f32 %v820_v26, %v819_v33 }
 0x372   : > { %v823_v34 = vadd.f32 %v822_v27, %v821_v21 }
 0x374   : > { %824 = vadd.xlane.f32.xlu0 %v823_v34 }
 0x38d   : > { %s1017_s11 = spop %1016 }
 0x38e   : > { %s1019_s12 = spop %1018  ;;  %s544_s15 = sadd.f32 1.0, %s1017_s11 }
 0x38f   : > { %s545_s1 = ssub.f32 %s1019_s12, %s1017_s11 }
 0x391   : > { %s546_s3 = sadd.f32 1.0, %s545_s1  ;;  %s1143_s1 = scalar_lea.hbm %s1501_s9, 16 }
 0x392   : > { %p1144_p1 = scmp.ne.s32.totalorder %s1501_s9, %s1143_s1  ;;  %p1149_p8 = scmp.lt.u32.totalorder %s1143_s1, %s1501_s9 }
 0x393   : > { %v547_v44 = vstv %s546_s3 }
 0x394   : > { %1111 = vrcp.f32 %v547_v44  ;;  %p1145_p4 = pnand %p1144_p1, %p1057_p0 }
 0x396   : > { %p1146_p6 = pneg %p1145_p4 }
 0x398   : > { %p1151_p9 = pnand %p1149_p8, %p1146_p6 }
 0x39e   : > { %v1112_v35 = vpop.eup %1111 }
 0x39f   : > { %1020 = vpush %v1112_v35 }
 0x3d0   : > { %s1021_s17 = spop %1020 }
 0x3d1   : > { %s550_s18 = smul.f32 %s1021_s17, %s544_s15 }
 0x3d3   : > { %s551_s19 = ssub.f32 1.0, %s550_s18 }
 0x3d5   : > { %s1460_s20 = sadd.f32 %s987_s16, %s551_s19 }
 0x3d7   : > { %852 = sst [smem:[#allocation2 + $0x1]] %s1460_s20  ;;  %s864_s27 = smul.f32 0.5, %s1460_s20 }
 0x401   : > { %v825_v41 = vpop.xlane.xlu0 %824 }
 0x402   : > { %v826_v42 = vrot.slane %v825_v41, 4 }
 0x404   : > { %v827_v43 = vadd.f32 %v826_v42, %v825_v41 }
 0x406   : > { %v828_v46 = vrot.slane %v827_v43, 2 }
 0x408   : > { %v829_v47 = vadd.f32 %v828_v46, %v827_v43 }
 0x40a   : > { %v830_v49 = vrot.slane %v829_v47, 1 }
 0x40c   : > { %v831_v50 = vadd.f32 %v830_v49, %v829_v47 }
 0x40e   : > { %1022 = vpush %v831_v50 }
 0x40f   : > { %1024 = vpush %v844_v51 }
 0x43f   : > { %s1023_s23 = spop %1022 }
 0x440   : > { %s854_s24 = sadd.f32 %s1023_s23, %s988_s21  ;;  %s1025_s25 = spop %1024 }
 0x441   : > { %s846_s26 = sadd.f32 %s1025_s25, %s833_s22 }
 0x442   : > { %856 = sst [smem:[#allocation2 + $0x2]] %s854_s24  ;;  %s869_s28 = smul.f32 0.1, %s854_s24 }
 0x443   : > { %848 = sst [smem:[#allocation2]] %s846_s26  ;;  %s862_s29 = smul.f32 0.001953125, %s846_s26 }
 0x444   : > { %s870_s10 = smul.f32 0.5, %s869_s28 }
 0x445   : > { %s865_s30 = sadd.f32 %s864_s27, %s862_s29 }
 0x446   : > { %1040 = sst [smem:[#allocation10 + $0x1]] (%p1057_p0), %s870_s10 }
 0x447   : > { %1039 = sst [smem:[#allocation10]] (%p1057_p0), %s865_s30 }
 0x448   : > { %1154 = shalt.err (!%p1151_p9)
}
 0x449   : > { %s1180_s18 = smov [#allocation10]  }
 0x44a   : > { %1042 = dma.smem_to_hbm (%p1057_p0), %s1180_s18, 16, %s1501_s9, [#allocation6]  }
 0x44b   : > { %1168 = dma.done.wait (%p1057_p0), [#allocation6], 16  }
 0x44c   : > { %1170 = vsyncadd (%p1057_p0), [#allocation6], 4294967280 }
 0x44d   : > { %886 = sfence }
 0x44e PF: > { %s24_s13 = sadd.s32 1, %s1173_s13  }
 0x44f   : > { %p21_p10 = scmp.ge.s32.totalorder %s24_s13, 4  }
 0x451   :  { %23 = sbr.rel (!%p21_p10) target bundleno = 6 (0x6), region = 114 }
 0x458   :  { %892 = vsyncpa [#allocation6], 1 }
 0x459   :  { %894 = vsyncpa [#allocation6 + $0x1], 1 }
 0x45a   :  { %895 = vsyncpa [#allocation7], 1 }
 0x45b   :  { %897 = vsyncpa [#allocation7 + $0x1], 1 }
 0x45c   :  { %898 = vsyncpa [#allocation9], 1 }

</bundles_post_ra>
